<compile_context>
chip_gen: v7x
topology: tpu7x:2x2x1
jax: 0.10.0
libtpu: 0.0.40
codegen_flags: <defaults>
</compile_context>

<pallas_src>
import functools

import jax
import jax.numpy as jnp
from jax.experimental import pallas as pl
from jax.experimental.pallas import tpu as pltpu


def _round_up(x: int, m: int) -> int:
    return (x + m - 1) // m * m


def action_arg_head_kernel(obs_ref, atp_ref, eo_ref,
                           wk_ref, bk_ref, wq_ref, bq_ref,
                           out_ref, *, batch, n_valid, n_pad):
    H = wk_ref.shape[1]

    # ---- key_raw = W_k(encoded_part_obs): one (B*Npad, E) @ (E, H) MXU pass ----------
    key = jnp.dot(eo_ref[...], wk_ref[...],
                  preferred_element_type=jnp.float32) + bk_ref[...]        # (B*Npad, H)
    key3 = key.reshape(batch, n_pad, H)   # cheap: n_pad is a multiple of 8 (sublane tiles)

    # ---- global mean / unbiased std over the VALID rows only (two-pass, ddof=1) ------
    key_stats = key3 if n_pad == n_valid else key3[:, :n_valid, :]          # (B, N, H)
    n = float(batch * n_valid * H)
    mean = jnp.sum(key_stats) / n
    centered = key_stats - mean
    var = jnp.sum(centered * centered) / (n - 1.0)                          # torch .std(): ddof=1
    inv = 1.0 / (jnp.sqrt(var) + 1e-8)   # single scalar; exact form is free after the fusion

    # ---- query = W_q(action_type_prob) + obs_embedding -------------------------------
    q = jnp.dot(atp_ref[...], wq_ref[...],
                preferred_element_type=jnp.float32) + bq_ref[...] + obs_ref[...]   # (B, H)
    qsum = jnp.sum(q, axis=1, keepdims=True)                                # (B, 1), hoisted

    # ---- logits: ONE batched MXU contraction, normalization fused algebraically ------
    #   logit[b,n] = sum_h q[b,h]*(key[b,n,h]-mean)*inv = (raw[b,n] - mean*qsum[b]) * inv
    q3 = q.reshape(batch, 1, H)                                             # (B, 1, H)
    raw = jax.lax.dot_general(
        q3, key3,
        dimension_numbers=(((2,), (2,)), ((0,), (0,))),                     # bqh,bnh->bqn
        preferred_element_type=jnp.float32)[:, 0, :]                        # (B, Npad)

    # ---- single lane-dense full-block store -------------------------------------------
    out_ref[...] = (raw - mean * qsum) * inv


def action_arg_head(obs_embedding, action_type_prob, encoded_part_obs, params,
                    matmul_dtype=None):
    """Pallas wrapper.  Grid-less: everything fits comfortably in VMEM at these sizes.

    Wrapper-side layout plumbing (free):
      * encoded_part_obs is zero-padded along N to a multiple of 128 and flattened to
        (B*Npad, E) so the kernel never reshapes inputs and the output store is
        lane-dense (unmasked vst).  Padding is sliced off after the call; the kernel's
        global stats ignore the padded rows.
      * Linear weights are stored pre-transposed as (in_features, out_features); biases
        kept 2-D (1, H).
      * matmul_dtype=jnp.bfloat16 feeds the MXU in bf16 for production E/H (accumulation
        and stats stay f32).  Default f32 - irrelevant at toy shapes.
    """
    wk_t, bk, wq_t, bq = params
    B, H = obs_embedding.shape
    _, N, E = encoded_part_obs.shape
    A = action_type_prob.shape[1]

    Npad = _round_up(max(N, 1), 128)
    if Npad != N:
        eo = jnp.pad(encoded_part_obs, ((0, 0), (0, Npad - N), (0, 0)))
    else:
        eo = encoded_part_obs
    eo_flat = eo.reshape(B * Npad, E)

    if matmul_dtype is not None:
        eo_flat = eo_flat.astype(matmul_dtype)
        wk_t = wk_t.astype(matmul_dtype)
        action_type_prob = action_type_prob.astype(matmul_dtype)
        wq_t = wq_t.astype(matmul_dtype)

    def _nbytes(a):
        return a.size * a.dtype.itemsize

    cost = pl.CostEstimate(
        flops=2 * B * Npad * E * H + 2 * B * A * H + 2 * B * Npad * H,
        transcendentals=0,
        bytes_accessed=(_nbytes(obs_embedding) + _nbytes(action_type_prob)
                        + _nbytes(eo_flat) + _nbytes(wk_t) + _nbytes(bk)
                        + _nbytes(wq_t) + _nbytes(bq) + B * Npad * 4),
    )

    vmem = pl.BlockSpec(memory_space=pltpu.MemorySpace.VMEM)
    kernel = functools.partial(action_arg_head_kernel,
                               batch=B, n_valid=N, n_pad=Npad)
    out = pl.pallas_call(
        kernel,
        out_shape=jax.ShapeDtypeStruct((B, Npad), jnp.float32),
        in_specs=[vmem] * 7,
        out_specs=vmem,
        cost_estimate=cost,
    )(obs_embedding, action_type_prob, eo_flat, wk_t, bk, wq_t, bq)
    return out[:, :N] if Npad != N else out


if __name__ == "__main__":
    # Small shapes consistent with the module's forward.
    B = 2    # batch
    N = 8    # number of "parts" / sequence length of encoded_part_obs
    E = 32   # encoded_part_obs_shape  (W_k in_features)
    A = 6    # action_type_prob_shape  (W_q in_features)
    H = 32   # hidden_size

    root = jax.random.PRNGKey(0)
    k = jax.random.split(root, 7)

    obs_embedding = jax.random.normal(k[0], (B, H), jnp.float32)
    action_type_prob = jax.nn.softmax(
        jax.random.normal(k[1], (B, A), jnp.float32), axis=-1)
    encoded_part_obs = jax.random.normal(k[2], (B, N, E), jnp.float32)

    # Deterministic parameter init, PyTorch-Linear-style U(-1/sqrt(in), 1/sqrt(in)).
    # Weights stored transposed: (in_features, out_features).
    wk_t = (jax.random.uniform(k[3], (E, H), jnp.float32) - 0.5) * (2.0 / jnp.sqrt(E))
    bk = (jax.random.uniform(k[4], (1, H), jnp.float32) - 0.5) * (2.0 / jnp.sqrt(E))
    wq_t = (jax.random.uniform(k[5], (A, H), jnp.float32) - 0.5) * (2.0 / jnp.sqrt(A))
    bq = (jax.random.uniform(k[6], (1, H), jnp.float32) - 0.5) * (2.0 / jnp.sqrt(A))

    out = action_arg_head(obs_embedding, action_type_prob, encoded_part_obs,
                          (wk_t, bk, wq_t, bq))
    out = jax.block_until_ready(out)

    # Pure-JAX reference (straightforward, two-pass std) for a correctness check.
    key_ref = jnp.einsum('bne,eh->bnh', encoded_part_obs, wk_t) + bk
    mean = jnp.mean(key_ref)
    std = jnp.sqrt(jnp.sum((key_ref - mean) ** 2) / (key_ref.size - 1))
    key_ref = (key_ref - mean) / (std + 1e-8)
    q_ref = action_type_prob @ wq_t + bq + obs_embedding
    logit_ref = jnp.einsum('bh,bnh->bn', q_ref, key_ref)

    assert out.shape == (B, N)
    assert jnp.allclose(out, logit_ref, atol=1e-3, rtol=1e-3), "mismatch vs JAX reference"
    print("KERNEL_OK")
</pallas_src>

<mosaic_0001>
module attributes {stable_mosaic.version = 11 : i64} {
  func.func @action_arg_head_kernel(%arg0: memref<2x32xf32, #tpu.memory_space<vmem>>, %arg1: memref<2x6xf32, #tpu.memory_space<vmem>>, %arg2: memref<256x32xf32, #tpu.memory_space<vmem>>, %arg3: memref<32x32xf32, #tpu.memory_space<vmem>>, %arg4: memref<1x32xf32, #tpu.memory_space<vmem>>, %arg5: memref<6x32xf32, #tpu.memory_space<vmem>>, %arg6: memref<1x32xf32, #tpu.memory_space<vmem>>, %arg7: memref<2x128xf32, #tpu.memory_space<vmem>>) attributes {dimension_semantics = [], scalar_prefetch = 0 : i64, scratch_operands = 0 : i64, tpu.core_type = #tpu.core_type<tc>} {
    %c0 = arith.constant 0 : index
    %c0_0 = arith.constant 0 : index
    %0 = vector.load %arg2[%c0, %c0_0] : memref<256x32xf32, #tpu.memory_space<vmem>>, vector<256x32xf32>
    %c0_1 = arith.constant 0 : index
    %c0_2 = arith.constant 0 : index
    %1 = vector.load %arg3[%c0_1, %c0_2] : memref<32x32xf32, #tpu.memory_space<vmem>>, vector<32x32xf32>
    %cst = arith.constant dense<0.000000e+00> : vector<256x32xf32>
    %2 = tpu.matmul %0, %1, %cst {dimension_numbers = #tpu.dot_dimension_numbers<[1], [0], [0], [1], [0, 0, 1, 1], [], []>} : vector<256x32xf32>, vector<32x32xf32>, vector<256x32xf32> -> vector<256x32xf32>
    %c0_3 = arith.constant 0 : index
    %c0_4 = arith.constant 0 : index
    %3 = vector.load %arg4[%c0_3, %c0_4] : memref<1x32xf32, #tpu.memory_space<vmem>>, vector<1x32xf32>
    %4 = vector.broadcast %3 : vector<1x32xf32> to vector<256x32xf32>
    %5 = arith.addf %2, %4 : vector<256x32xf32>
    %6 = vector.shape_cast %5 : vector<256x32xf32> to vector<2x128x32xf32>
    %7 = vector.extract_strided_slice %6 {offsets = [0, 0, 0], sizes = [2, 8, 32], strides = [1, 1, 1]} : vector<2x128x32xf32> to vector<2x8x32xf32>
    %8 = vector.shape_cast %7 : vector<2x8x32xf32> to vector<1x2x8x32xf32>
    %cst_5 = arith.constant dense<0.000000e+00> : vector<1xf32>
    %9 = vector.multi_reduction <add>, %8, %cst_5 [1, 2, 3] : vector<1x2x8x32xf32> to vector<1xf32>
    %10 = vector.shape_cast %9 : vector<1xf32> to vector<1x1x1x1xf32>
    %11 = vector.extract %10[0, 0, 0, 0] : f32 from vector<1x1x1x1xf32>
    %cst_6 = arith.constant 5.120000e+02 : f32
    %12 = arith.divf %11, %cst_6 : f32
    %13 = vector.broadcast %12 : f32 to vector<2x8x32xf32>
    %14 = arith.subf %7, %13 : vector<2x8x32xf32>
    %15 = arith.mulf %14, %14 : vector<2x8x32xf32>
    %16 = vector.shape_cast %15 : vector<2x8x32xf32> to vector<1x2x8x32xf32>
    %cst_7 = arith.constant dense<0.000000e+00> : vector<1xf32>
    %17 = vector.multi_reduction <add>, %16, %cst_7 [1, 2, 3] : vector<1x2x8x32xf32> to vector<1xf32>
    %18 = vector.shape_cast %17 : vector<1xf32> to vector<1x1x1x1xf32>
    %19 = vector.extract %18[0, 0, 0, 0] : f32 from vector<1x1x1x1xf32>
    %cst_8 = arith.constant 5.110000e+02 : f32
    %20 = arith.divf %19, %cst_8 : f32
    %21 = math.sqrt %20 : f32
    %cst_9 = arith.constant 9.99999993E-9 : f32
    %22 = arith.addf %21, %cst_9 : f32
    %cst_10 = arith.constant 1.000000e+00 : f32
    %23 = arith.divf %cst_10, %22 : f32
    %c0_11 = arith.constant 0 : index
    %c0_12 = arith.constant 0 : index
    %24 = vector.load %arg1[%c0_11, %c0_12] : memref<2x6xf32, #tpu.memory_space<vmem>>, vector<2x6xf32>
    %c0_13 = arith.constant 0 : index
    %c0_14 = arith.constant 0 : index
    %25 = vector.load %arg5[%c0_13, %c0_14] : memref<6x32xf32, #tpu.memory_space<vmem>>, vector<6x32xf32>
    %cst_15 = arith.constant dense<0.000000e+00> : vector<2x32xf32>
    %26 = tpu.matmul %24, %25, %cst_15 {dimension_numbers = #tpu.dot_dimension_numbers<[1], [0], [0], [1], [0, 0, 1, 1], [], []>} : vector<2x6xf32>, vector<6x32xf32>, vector<2x32xf32> -> vector<2x32xf32>
    %c0_16 = arith.constant 0 : index
    %c0_17 = arith.constant 0 : index
    %27 = vector.load %arg6[%c0_16, %c0_17] : memref<1x32xf32, #tpu.memory_space<vmem>>, vector<1x32xf32>
    %28 = vector.broadcast %27 : vector<1x32xf32> to vector<2x32xf32>
    %29 = arith.addf %26, %28 : vector<2x32xf32>
    %c0_18 = arith.constant 0 : index
    %c0_19 = arith.constant 0 : index
    %30 = vector.load %arg0[%c0_18, %c0_19] : memref<2x32xf32, #tpu.memory_space<vmem>>, vector<2x32xf32>
    %31 = arith.addf %29, %30 : vector<2x32xf32>
    %cst_20 = arith.constant dense<0.000000e+00> : vector<2xf32>
    %32 = vector.multi_reduction <add>, %31, %cst_20 [1] : vector<2x32xf32> to vector<2xf32>
    %33 = vector.shape_cast %32 : vector<2xf32> to vector<2x1xf32>
    %34 = vector.shape_cast %31 : vector<2x32xf32> to vector<2x1x32xf32>
    %cst_21 = arith.constant dense<0.000000e+00> : vector<2x1x128xf32>
    %35 = tpu.matmul %34, %6, %cst_21 {dimension_numbers = #tpu.dot_dimension_numbers<[2], [2], [1], [1], [0, 0, 0, 1, 1, 1], [0], [0]>} : vector<2x1x32xf32>, vector<2x128x32xf32>, vector<2x1x128xf32> -> vector<2x1x128xf32>
    %36 = vector.shape_cast %35 : vector<2x1x128xf32> to vector<2x128xf32>
    %37 = vector.broadcast %12 : f32 to vector<2x1xf32>
    %38 = arith.mulf %37, %33 : vector<2x1xf32>
    %39 = vector.broadcast %38 : vector<2x1xf32> to vector<2x128xf32>
    %40 = arith.subf %36, %39 : vector<2x128xf32>
    %41 = vector.broadcast %23 : f32 to vector<2x128xf32>
    %42 = arith.mulf %40, %41 : vector<2x128xf32>
    %c0_22 = arith.constant 0 : index
    %c0_23 = arith.constant 0 : index
    %43 = vector.load %arg7[%c0_22, %c0_23] : memref<2x128xf32, #tpu.memory_space<vmem>>, vector<2x128xf32>
    tpu.vector_store %arg7[%c0_22, %c0_23], %42 {strides = array<i32>} : memref<2x128xf32, #tpu.memory_space<vmem>>, vector<2x128xf32>,
    return
  }
}

</mosaic_0001>

<bundles_post_ra>
// kernel: tpu_custom_call.1
= control target key start
LH: loop header
LB: loop body
LE: loop exit
PB: predicated region body
PF: predicated region fallthrough
CT: control target
= control target key end

     0   :  { %vm70_vm0 = vcmask 261120   ;;  %v1213_v6 = vmov 0.0   ;;  %vm1214_vm1 = vmmov 0   ;;  %vm453_vm2 = vcmask 1045504   ;;  %s1546_s0 = inlined_call_operand.vmem [shape: f32[2,32], index: 0, kind: input, shape index: {}]   ;;  %s1547_s1 = inlined_call_operand.vmem [shape: f32[2,6], index: 1, kind: input, shape index: {}]   ;;  %s1548_s2 = inlined_call_operand.vmem [shape: f32[256,32], index: 2, kind: input, shape index: {}]   ;;  %s1549_s3 = inlined_call_operand.vmem [shape: f32[32,32], index: 3, kind: input, shape index: {}]   ;;  %s1550_s4 = inlined_call_operand.vmem [shape: f32[1,32], index: 4, kind: input, shape index: {}]   ;;  %s1551_s5 = inlined_call_operand.vmem [shape: f32[6,32], index: 5, kind: input, shape index: {}]   ;;  %s1552_s6 = inlined_call_operand.vmem [shape: f32[1,32], index: 6, kind: input, shape index: {}]   ;;  %s1553_s7 = inlined_call_operand.hbm [shape: f32[2,128], index: 7, kind: output, shape index: {}]  }
   0x1   :  { %v59_v0 = vld [vmem:[%s1549_s3] sm:$0xff]  ;;  %v60_v1 = vld [vmem:[%s1549_s3 + $0x8] sm:$0xff]  ;;  %v61_v2 = vld [vmem:[%s1549_s3 + $0x10] sm:$0xff]  ;;  %1025 = vmatprep.subr.mxu1 %v1213_v6  ;;  %1027 = vmatprep.mubr.msk.f32.mxu1 %vm1214_vm1, %v1213_v6  ;;  %vm449_vm3 = vcmask 48128  }
   0x2   :  { %v1100_v3 = vpack.c.bf16 %v60_v1, %v59_v0  ;;  %v62_v4 = vld [vmem:[%s1549_s3 + $0x18] sm:$0xff]  ;;  %v27_v5 = vld [vmem:[%s1548_s2] sm:$0xff]  ;;  %v28_v8 = vld [vmem:[%s1548_s2 + $0x8] sm:$0xff] }
   0x3   :  { %v1104_v7 = vpack.c.bf16 %v62_v4, %v61_v2  ;;  %977 = vmatprep.mubr.msk.f32.mxu0 %vm70_vm0, %v27_v5  ;;  %v29_v9 = vld [vmem:[%s1548_s2 + $0x10] sm:$0xff]  ;;  %v441_v10 = vld [vmem:[%s1551_s5] sm:$0x3f]  ;;  %v30_v12 = vld [vmem:[%s1548_s2 + $0x18] sm:$0xff] }
   0x4   :  { %1101 = vmatprep.subr.bf16.mxu0 %v1100_v3  ;;  %v440_v11 = vld [vmem:[%s1547_s1] sm:$0x3]  ;;  %1026 = vmatpush3.msk.msra.mxu1 %vm453_vm2, %v441_v10 }
   0x5   :  { %1103 = vmatpush3.bf16.msra.mxu0 %v1100_v3  ;;  %1028 = vmatmul.mubr.msk.f32.vlgmr.msra.gmra.mrb[0].mxu1 %vm449_vm3, %v440_v11 }
   0x6   :  { %1105 = vmatprep.subr.bf16.mxu0 %v1104_v7  ;;  %1062 = vmatprep.mubr.msk.f32.mxu1 %vm1214_vm1, %v1213_v6 }
   0x9   :  { %1107 = vmatpush3.bf16.msra.mxu0 %v1104_v7 }
   0xc   :  { %978 = vmatmul.mubr.msk.f32.vlgmr.msra.gmra.mrb[0].mxu0 %vm70_vm0, %v28_v8 }
   0xd   :  { %980 = vmatprep.mubr.msk.f32.mxu0 %vm70_vm0, %v29_v9 }
   0xe   :  { %12 = vsyncpa [#allocation3], 0  ;;  %v31_v13 = vld [vmem:[%s1548_s2 + $0x20] sm:$0xff]  ;;  %v32_v14 = vld [vmem:[%s1548_s2 + $0x28] sm:$0xff]  ;;  %v1215_v41 = vmov 0.0|0.0   ;;  %vm529_vm4 = vcmask 254976  }
   0xf   :  { %v33_v15 = vld [vmem:[%s1548_s2 + $0x30] sm:$0xff]  ;;  %v34_v16 = vld [vmem:[%s1548_s2 + $0x38] sm:$0xff]  ;;  %v35_v17 = vld [vmem:[%s1548_s2 + $0x40] sm:$0xff]  ;;  %1108 = vmatprep.subr.bf16.mxu1 %v1215_v41  ;;  %1140 = vmatprep.subr.bf16.mxu0 %v1215_v41  ;;  %s1217_s8 = smov [#allocation2]   ;;  %vm809_vm8 = vcmask 1041409  }
  0x10   :  { %981 = vmatmul.mubr.msk.f32.gmra.mrb[2].mxu0 %vm70_vm0, %v30_v12  ;;  %v36_v18 = vld [vmem:[%s1548_s2 + $0x48] sm:$0xff]  ;;  %v37_v19 = vld [vmem:[%s1548_s2 + $0x50] sm:$0xff]  ;;  %v38_v20 = vld [vmem:[%s1548_s2 + $0x58] sm:$0xff]  ;;  %s819_s9 = sshll.u32 %s1217_s8, 4  ;;  %s820_s9 = int_to_ptr.vmem [resolvable:$true] %s819_s9 }
  0x11   :  { %983 = vmatprep.mubr.msk.f32.mxu0 %vm70_vm0, %v31_v13  ;;  %v39_v21 = vld [vmem:[%s1548_s2 + $0x60] sm:$0xff]  ;;  %v40_v22 = vld [vmem:[%s1548_s2 + $0x68] sm:$0xff]  ;;  %v41_v23 = vld [vmem:[%s1548_s2 + $0x70] sm:$0xff]  ;;  %s1189_s10 = scalar_lea.vmem %s820_s9, 32  ;;  %p1194_p1 = scmp.lt.s32.totalorder %s820_s9, %s820_s9 }
  0x12   :  { %v42_v24 = vld [vmem:[%s1548_s2 + $0x78] sm:$0xff]  ;;  %v43_v25 = vld [vmem:[%s1548_s2 + $0x80] sm:$0xff]  ;;  %v44_v26 = vld [vmem:[%s1548_s2 + $0x88] sm:$0xff]  ;;  %p1190_p0 = scmp.ne.s32.totalorder %s820_s9, %s1189_s10  ;;  %p1195_p2 = scmp.lt.s32.totalorder %s1189_s10, %s1189_s10 }
  0x13   :  { %v45_v27 = vld [vmem:[%s1548_s2 + $0x90] sm:$0xff]  ;;  %v46_v28 = vld [vmem:[%s1548_s2 + $0x98] sm:$0xff]  ;;  %v47_v29 = vld [vmem:[%s1548_s2 + $0xa0] sm:$0xff] }
  0x14   :  { %984 = vmatmul.mubr.msk.f32.gmra.mrb[4].mxu0 %vm70_vm0, %v32_v14  ;;  %v48_v30 = vld [vmem:[%s1548_s2 + $0xa8] sm:$0xff]  ;;  %v49_v31 = vld [vmem:[%s1548_s2 + $0xb0] sm:$0xff]  ;;  %v50_v32 = vld [vmem:[%s1548_s2 + $0xb8] sm:$0xff]  ;;  %p1196_p3 = por %p1195_p2, %p1194_p1 }
  0x15   :  { %986 = vmatprep.mubr.msk.f32.mxu0 %vm70_vm0, %v33_v15  ;;  %v51_v33 = vld [vmem:[%s1548_s2 + $0xc0] sm:$0xff]  ;;  %v52_v34 = vld [vmem:[%s1548_s2 + $0xc8] sm:$0xff]  ;;  %v53_v35 = vld [vmem:[%s1548_s2 + $0xd0] sm:$0xff] }
  0x16   :  { %v54_v36 = vld [vmem:[%s1548_s2 + $0xd8] sm:$0xff]  ;;  %v55_v37 = vld [vmem:[%s1548_s2 + $0xe0] sm:$0xff]  ;;  %v56_v38 = vld [vmem:[%s1548_s2 + $0xe8] sm:$0xff]  ;;  %p1197_p4 = pnand %p1196_p3, %p1190_p0 }
  0x17   :  { %v57_v39 = vld [vmem:[%s1548_s2 + $0xf0] sm:$0xff]  ;;  %v58_v40 = vld [vmem:[%s1548_s2 + $0xf8] sm:$0xff]  ;;  %v1416_v42 = vld [vmem:[%s1550_s4] ss:$0 sm:$0xff] }
  0x18   :  { %987 = vmatmul.mubr.msk.f32.gmra.mrb[6].mxu0 %vm70_vm0, %v34_v16  ;;  %v860_v43 = vld [vmem:[%s1552_s6] ss:$0 sm:$0xff]  ;;  %vm1430_vm5 = vmpackc.low %vm70_vm0, %vm70_vm0 }
  0x19   :  { %989 = vmatprep.mubr.msk.f32.mxu0 %vm70_vm0, %v35_v17  ;;  %v527_v46 = vld [vmem:[%s1546_s0] sm:$0x3] }
  0x1c   :  { %990 = vmatmul.mubr.msk.f32.gmra.mrb[8].mxu0 %vm70_vm0, %v36_v18 }
  0x1d   :  { %992 = vmatprep.mubr.msk.f32.mxu0 %vm70_vm0, %v37_v19 }
  0x20   :  { %993 = vmatmul.mubr.msk.f32.gmra.mrb[10].mxu0 %vm70_vm0, %v38_v20 }
  0x21   :  { %995 = vmatprep.mubr.msk.f32.mxu0 %vm70_vm0, %v39_v21 }
  0x24   :  { %996 = vmatmul.mubr.msk.f32.gmra.mrb[12].mxu0 %vm70_vm0, %v40_v22 }
  0x25   :  { %998 = vmatprep.mubr.msk.f32.mxu0 %vm70_vm0, %v41_v23 }
  0x28   :  { %999 = vmatmul.mubr.msk.f32.gmra.mrb[14].mxu0 %vm70_vm0, %v42_v24 }
  0x29   :  { %1001 = vmatprep.mubr.msk.f32.mxu0 %vm70_vm0, %v43_v25 }
  0x2c   :  { %1002 = vmatmul.mubr.msk.f32.gmra.mrb[16].mxu0 %vm70_vm0, %v44_v26 }
  0x2d   :  { %1004 = vmatprep.mubr.msk.f32.mxu0 %vm70_vm0, %v45_v27 }
  0x30   :  { %1005 = vmatmul.mubr.msk.f32.gmra.mrb[18].mxu0 %vm70_vm0, %v46_v28 }
  0x31   :  { %1007 = vmatprep.mubr.msk.f32.mxu0 %vm70_vm0, %v47_v29 }
  0x34   :  { %1008 = vmatmul.mubr.msk.f32.gmra.mrb[20].mxu0 %vm70_vm0, %v48_v30 }
  0x35   :  { %1010 = vmatprep.mubr.msk.f32.mxu0 %vm70_vm0, %v49_v31 }
  0x38   :  { %1011 = vmatmul.mubr.msk.f32.gmra.mrb[22].mxu0 %vm70_vm0, %v50_v32 }
  0x39   :  { %1013 = vmatprep.mubr.msk.f32.mxu0 %vm70_vm0, %v51_v33 }
  0x3c   :  { %1014 = vmatmul.mubr.msk.f32.gmra.mrb[24].mxu0 %vm70_vm0, %v52_v34 }
  0x3d   :  { %1016 = vmatprep.mubr.msk.f32.mxu0 %vm70_vm0, %v53_v35 }
  0x40   :  { %1017 = vmatmul.mubr.msk.f32.gmra.mrb[26].mxu0 %vm70_vm0, %v54_v36 }
  0x41   :  { %1019 = vmatprep.mubr.msk.f32.mxu0 %vm70_vm0, %v55_v37 }
  0x44   :  { %1020 = vmatmul.mubr.msk.f32.gmra.mrb[28].mxu0 %vm70_vm0, %v56_v38 }
  0x45   :  { %1022 = vmatprep.mubr.msk.f32.mxu0 %vm70_vm0, %v57_v39 }
  0x48   :  { %1023 = vmatmul.mubr.msk.f32.gmra.mrb[30].mxu0 %vm70_vm0, %v58_v40 }
  0x49   :  { %1097 = vmatprep.mubr.msk.f32.mxu0 %vm1214_vm1, %v1213_v6 }
  0xd8   :  { %v523_v45 = vpop.f32.mrb[0].mxu1 }
  0xd9   :  { %v524_v49 = vadd.f32 %v860_v43, %v523_v45  ;;  %v1029_v50 = vpop.f32.mrb[1].mxu1 }
  0xdb   :  { %v1434_v53 = vadd.f32 %v527_v46, %v524_v49 }
  0xdd   :  { %v530_v58 = vsel %vm529_vm4, %v1434_v53, 0.0 }
  0xde   :  { %531 = vadd.xlane.f32.xlu1 %v530_v58  ;;  %v537_v58 = vlaneseq }
  0xdf   :  { %v979_v44 = vpop.f32.mrb[0].mxu0 }
  0xe0   :  { %v239_v47 = vadd.f32 %v979_v44, %v1416_v42  ;;  %v233_v48 = vpop.f32.mrb[1].mxu0 }
  0xe1   :  { %v1426_v51 = vadd.f32 %v1416_v42, %v233_v48 }
  0xe3   :  { %v1109_v54 = vpack.c.bf16 %v239_v47, %v1426_v51  ;;  %v982_v55 = vpop.f32.mrb[2].mxu0  ;;  %v392_v32 = vsel %vm70_vm0, %v1426_v51, 0.0 }
  0xe4   :  { %v249_v56 = vadd.f32 %v982_v55, %v1416_v42  ;;  %v243_v57 = vpop.f32.mrb[3].mxu0 }
  0xe5   :  { %v244_v59 = vadd.f32 %v1416_v42, %v243_v57  ;;  %1111 = vmatpush3.bf16.xpose.msk.msra.mxu1 %vm1430_vm5, %v1109_v54 }
  0xe6   :  { %1112 = vmatprep.subr.bf16.mxu1 %v1215_v41 }
  0xe7   :  { %v1113_v60 = vpack.c.bf16 %v249_v56, %v244_v59  ;;  %v985_v61 = vpop.f32.mrb[4].mxu0  ;;  %v1216_v56 = vmov 1966171168  }
  0xe8   :  { %v259_v62 = vadd.f32 %v985_v61, %v1416_v42  ;;  %v253_v63 = vpop.f32.mrb[5].mxu0  ;;  %v535_v57 = vunpack.c.l.s4 %v1216_v56 }
  0xe9   :  { %v254_v0 = vadd.f32 %v1416_v42, %v253_v63 }
  0xeb   :  { %v1117_v1 = vpack.c.bf16 %v259_v62, %v254_v0  ;;  %v988_v2 = vpop.f32.mrb[6].mxu0  ;;  %v536_v0 = vunpack.c.0.s8 %v535_v57 }
  0xec   :  { %v269_v3 = vadd.f32 %v988_v2, %v1416_v42  ;;  %v263_v4 = vpop.f32.mrb[7].mxu0 }
  0xed   :  { %v264_v5 = vadd.f32 %v1416_v42, %v263_v4  ;;  %1115 = vmatpush3.bf16.xpose.msk.msra.mxu1 %vm1430_vm5, %v1113_v60 }
  0xee   :  { %1116 = vmatprep.subr.bf16.mxu1 %v1215_v41 }
  0xef   :  { %v1121_v6 = vpack.c.bf16 %v269_v3, %v264_v5  ;;  %v991_v7 = vpop.f32.mrb[8].mxu0 }
  0xf0   :  { %v279_v8 = vadd.f32 %v991_v7, %v1416_v42  ;;  %v273_v9 = vpop.f32.mrb[9].mxu0 }
  0xf1   :  { %v274_v10 = vadd.f32 %v1416_v42, %v273_v9 }
  0xf3   :  { %v1125_v11 = vpack.c.bf16 %v279_v8, %v274_v10  ;;  %v994_v12 = vpop.f32.mrb[10].mxu0 }
  0xf4   :  { %v289_v13 = vadd.f32 %v994_v12, %v1416_v42  ;;  %v283_v14 = vpop.f32.mrb[11].mxu0 }
  0xf5   :  { %v284_v15 = vadd.f32 %v1416_v42, %v283_v14  ;;  %1119 = vmatpush3.bf16.xpose.msk.msra.mxu1 %vm1430_vm5, %v1117_v1  ;;  %v538_v1 = vshrl.u32 %v537_v58, 7 }
  0xf6   :  { %1120 = vmatprep.subr.bf16.mxu1 %v1215_v41 }
  0xf7   :  { %v1129_v16 = vpack.c.bf16 %v289_v13, %v284_v15  ;;  %v997_v17 = vpop.f32.mrb[12].mxu0  ;;  %v539_v7 = vsub.s32 %v536_v0, %v538_v1 }
  0xf8   :  { %v299_v18 = vadd.f32 %v997_v17, %v1416_v42  ;;  %v293_v19 = vpop.f32.mrb[13].mxu0 }
  0xf9   :  { %v294_v20 = vadd.f32 %v1416_v42, %v293_v19  ;;  %v540_v13 = vrot.slane %v1434_v53, %v539_v7 }
  0xfb   :  { %v1133_v21 = vpack.c.bf16 %v299_v18, %v294_v20  ;;  %v1000_v22 = vpop.f32.mrb[14].mxu0  ;;  %v548_v18 = vrot.slane %v540_v13, %v539_v7 }
  0xfc   :  { %v1460_v23 = vadd.f32 %v1000_v22, %v1416_v42  ;;  %v303_v24 = vpop.f32.mrb[15].mxu0 }
  0xfd   :  { %v1463_v25 = vadd.f32 %v1416_v42, %v303_v24  ;;  %1123 = vmatpush3.bf16.xpose.msk.msra.mxu1 %vm1430_vm5, %v1121_v6 }
  0xfe   :  { %1124 = vmatprep.subr.bf16.mxu1 %v1215_v41 }
  0xff   :  { %v1137_v26 = vpack.c.bf16 %v1460_v23, %v1463_v25  ;;  %v1003_v27 = vpop.f32.mrb[16].mxu0 }
 0x100   :  { %v319_v28 = vadd.f32 %v1003_v27, %v1416_v42  ;;  %v313_v29 = vpop.f32.mrb[17].mxu0 }
 0x101   :  { %v1472_v30 = vadd.f32 %v1416_v42, %v313_v29 }
 0x103   :  { %v1141_v31 = vpack.c.bf16 %v319_v28, %v1472_v30  ;;  %v393_v33 = vsel %vm70_vm0, %v1472_v30, 0.0  ;;  %v1006_v34 = vpop.f32.mrb[18].mxu0 }
 0x104   :  { %v394_v35 = vadd.f32 %v393_v33, %v392_v32  ;;  %v329_v36 = vadd.f32 %v1006_v34, %v1416_v42  ;;  %v323_v37 = vpop.f32.mrb[19].mxu0 }
 0x105   :  { %1127 = vmatpush3.bf16.xpose.msk.msra.mxu1 %vm1430_vm5, %v1125_v11  ;;  %1143 = vmatpush3.bf16.xpose.msk.msra.mxu0 %vm1430_vm5, %v1141_v31  ;;  %v324_v38 = vadd.f32 %v1416_v42, %v323_v37 }
 0x106   :  { %395 = vadd.xlane.f32.xlu0 %v394_v35  ;;  %1128 = vmatprep.subr.bf16.mxu1 %v1215_v41 }
 0x107   :  { %v1145_v39 = vpack.c.bf16 %v329_v36, %v324_v38  ;;  %1144 = vmatprep.subr.bf16.mxu0 %v1215_v41  ;;  %v1009_v40 = vpop.f32.mrb[20].mxu0 }
 0x108   :  { %v339_v43 = vadd.f32 %v1009_v40, %v1416_v42  ;;  %v333_v44 = vpop.f32.mrb[21].mxu0 }
 0x109   :  { %v334_v45 = vadd.f32 %v1416_v42, %v333_v44 }
 0x10b   :  { %v1149_v46 = vpack.c.bf16 %v339_v43, %v334_v45  ;;  %v1012_v47 = vpop.f32.mrb[22].mxu0 }
 0x10c   :  { %v349_v48 = vadd.f32 %v1012_v47, %v1416_v42  ;;  %v343_v49 = vpop.f32.mrb[23].mxu0 }
 0x10d   :  { %1131 = vmatpush3.bf16.xpose.msk.msra.mxu1 %vm1430_vm5, %v1129_v16  ;;  %1147 = vmatpush3.bf16.xpose.msk.msra.mxu0 %vm1430_vm5, %v1145_v39  ;;  %v344_v50 = vadd.f32 %v1416_v42, %v343_v49 }
 0x10e   :  { %1132 = vmatprep.subr.bf16.mxu1 %v1215_v41  ;;  %1148 = vmatprep.subr.bf16.mxu0 %v1215_v41 }
 0x10f   :  { %v1153_v54 = vpack.c.bf16 %v349_v48, %v344_v50  ;;  %v1015_v55 = vpop.f32.mrb[24].mxu0 }
 0x110   :  { %v359_v59 = vadd.f32 %v1015_v55, %v1416_v42  ;;  %v353_v60 = vpop.f32.mrb[25].mxu0 }
 0x111   :  { %v354_v61 = vadd.f32 %v1416_v42, %v353_v60 }
 0x113   :  { %v1157_v62 = vpack.c.bf16 %v359_v59, %v354_v61  ;;  %v1018_v63 = vpop.f32.mrb[26].mxu0 }
 0x114   :  { %v369_v2 = vadd.f32 %v1018_v63, %v1416_v42  ;;  %v363_v3 = vpop.f32.mrb[27].mxu0 }
 0x115   :  { %1135 = vmatpush3.bf16.xpose.msk.msra.mxu1 %vm1430_vm5, %v1133_v21  ;;  %1151 = vmatpush3.bf16.xpose.msk.msra.mxu0 %vm1430_vm5, %v1149_v46  ;;  %v364_v4 = vadd.f32 %v1416_v42, %v363_v3 }
 0x116   :  { %1136 = vmatprep.subr.bf16.mxu1 %v1215_v41  ;;  %1152 = vmatprep.subr.bf16.mxu0 %v1215_v41 }
 0x117   :  { %v1161_v5 = vpack.c.bf16 %v369_v2, %v364_v4  ;;  %v1021_v6 = vpop.f32.mrb[28].mxu0 }
 0x118   :  { %v379_v8 = vadd.f32 %v1021_v6, %v1416_v42  ;;  %v373_v9 = vpop.f32.mrb[29].mxu0 }
 0x119   :  { %v374_v10 = vadd.f32 %v1416_v42, %v373_v9 }
 0x11b   :  { %v1165_v11 = vpack.c.bf16 %v379_v8, %v374_v10  ;;  %v1024_v12 = vpop.f32.mrb[30].mxu0 }
 0x11c   :  { %v389_v14 = vadd.f32 %v1024_v12, %v1416_v42  ;;  %v383_v15 = vpop.f32.mrb[31].mxu0 }
 0x11d   :  { %1139 = vmatpush3.bf16.xpose.msk.msra.mxu1 %vm1430_vm5, %v1137_v26  ;;  %1155 = vmatpush3.bf16.xpose.msk.msra.mxu0 %vm1430_vm5, %v1153_v54  ;;  %v384_v16 = vadd.f32 %v1416_v42, %v383_v15  ;;  %v541_v42 = vcombine.high %v540_v13, %v540_v13 }
 0x11e   :  { %1156 = vmatprep.subr.bf16.mxu0 %v1215_v41 }
 0x11f   :  { %v1169_v17 = vpack.c.bf16 %v389_v14, %v384_v16  ;;  %v555_v53 = vrot.slane %v541_v42, %v539_v7 }
 0x124   :  { %1063 = vmatmul.mubr.msk.f32.vlgmr.msra.gmra.mrb[2].mxu1 %vm70_vm0, %v548_v18 }
 0x125   :  { %1159 = vmatpush3.bf16.xpose.msk.msra.mxu0 %vm1430_vm5, %v1157_v62 }
 0x126   :  { %1160 = vmatprep.subr.bf16.mxu0 %v1215_v41 }
 0x12d   :  { %1163 = vmatpush3.bf16.xpose.msk.msra.mxu0 %vm1430_vm5, %v1161_v5 }
 0x12e   :  { %1164 = vmatprep.subr.bf16.mxu0 %v1215_v41 }
 0x135   :  { %1167 = vmatpush3.bf16.xpose.msk.msra.mxu0 %vm1430_vm5, %v1165_v11 }
 0x136   :  { %1168 = vmatprep.subr.bf16.mxu0 %v1215_v41 }
 0x13d   :  { %1171 = vmatpush3.bf16.xpose.msk.msra.mxu0 %vm1430_vm5, %v1169_v17 }
 0x144   :  { %1098 = vmatmul.mubr.msk.f32.vlgmr.msra.gmra.mrb[32].mxu0 %vm70_vm0, %v555_v53 }
 0x16b   :  { %v532_v33 = vpop.xlane.xlu1 %531 }
 0x193   :  { %v396_v19 = vpop.xlane.xlu0 %395 }
 0x194   :  { %v397_v20 = vrot.slane %v396_v19, 4 }
 0x196   :  { %v398_v21 = vadd.f32 %v397_v20, %v396_v19 }
 0x198   :  { %v399_v22 = vrot.slane %v398_v21, 2 }
 0x19a   :  { %v400_v23 = vadd.f32 %v399_v22, %v398_v21 }
 0x19c   :  { %v401_v24 = vrot.slane %v400_v23, 1 }
 0x19e   :  { %v402_v25 = vadd.f32 %v401_v24, %v400_v23 }
 0x1a0   :  { %1172 = vpush %v402_v25 }
 0x1d1   :  { %s1173_s0 = spop %1172 }
 0x1d2   :  { %s406_s4 = smul.f32 0.001953125, %s1173_s0 }
 0x1d4   :  { %v407_v26 = vstv %s406_s4 }
 0x1d5   :  { %v408_v41 = vsub.f32 %v1426_v51, %v407_v26  ;;  %v409_v27 = vsub.f32 %v1472_v30, %v407_v26  ;;  %v796_v34 = vmul.f32 %v532_v33, %v407_v26 }
 0x1d7   :  { %v410_v52 = vmul.f32 %v408_v41, %v408_v41  ;;  %v411_v28 = vmul.f32 %v409_v27, %v409_v27  ;;  %v798_v38 = vrot.slane %v796_v34, 1 }
 0x1d9   :  { %v412_v29 = vsel %vm70_vm0, %v410_v52, 0.0  ;;  %v413_v31 = vsel %vm70_vm0, %v411_v28, 0.0 }
 0x1da   :  { %v414_v32 = vadd.f32 %v413_v31, %v412_v29 }
 0x1dc   :  { %415 = vadd.xlane.f32.xlu0 %v414_v32 }
 0x1f7   :  { %v672_v35 = vpop.f32.mrb[2].mxu1 }
 0x1f8   :  { %v801_v36 = vsub.f32 %v672_v35, %v796_v34  ;;  %v1064_v37 = vpop.f32.mrb[3].mxu1 }
 0x217   :  { %v792_v39 = vpop.f32.mrb[32].mxu0 }
 0x218   :  { %v802_v40 = vsub.f32 %v792_v39, %v798_v38  ;;  %v1099_v43 = vpop.f32.mrb[33].mxu0 }
 0x269   :  { %v416_v51 = vpop.xlane.xlu0 %415 }
 0x26a   :  { %v417_v44 = vrot.slane %v416_v51, 4 }
 0x26c   :  { %v418_v30 = vadd.f32 %v417_v44, %v416_v51 }
 0x26e   :  { %v419_v45 = vrot.slane %v418_v30, 2 }
 0x270   :  { %v420_v46 = vadd.f32 %v419_v45, %v418_v30 }
 0x272   :  { %v421_v47 = vrot.slane %v420_v46, 1 }
 0x274   :  { %v422_v48 = vadd.f32 %v421_v47, %v420_v46 }
 0x276   :  { %1174 = vpush %v422_v48 }
 0x2a7   :  { %s1175_s6 = spop %1174 }
 0x2a8   :  { %s426_s27 = smul.f32 0.0019569471, %s1175_s6 }
 0x2aa   :  { %v427_v49 = vstv %s426_s27 }
 0x2ab   :  { %1185 = vrsqrt.f32 %v427_v49  ;;  %vm430_vm6 = vcmp.eq.f32.partialorder %v427_v49, inf  ;;  %v433_v55 = vand.u32 2147483648, %v427_v49  ;;  %vm432_vm7 = vcmp.eq.f32.partialorder %v427_v49, 0.0 }
 0x2b5   :  { %v1186_v50 = vpop.eup %1185 }
 0x2b6   :  { %v429_v54 = vmul.f32 %v1186_v50, %v427_v49 }
 0x2b8   :  { %v431_v56 = vsel %vm430_vm6, %v427_v49, %v429_v54 }
 0x2b9   :  { %v434_v57 = vsel %vm432_vm7, %v433_v55, %v431_v56 }
 0x2ba   :  { %1176 = vpush %v434_v57 }
 0x2eb   :  { %s1177_s28 = spop %1176 }
 0x2ec   :  { %s436_s29 = sadd.f32 1e-08, %s1177_s28 }
 0x2ee   :  { %v437_v58 = vstv %s436_s29 }
 0x2ef   :  { %1187 = vrcp.f32 %v437_v58 }
 0x2f9   :  { %v1188_v59 = vpop.eup %1187 }
 0x2fa   :  { %1178 = vpush %v1188_v59 }
 0x32b   :  { %s1179_s30 = spop %1178 }
 0x32c   :  { %v803_v60 = vstv %s1179_s30 }
 0x32d   :  { %v805_v61 = vmul.f32 %v803_v60, %v802_v40  ;;  %v804_v62 = vmul.f32 %v803_v60, %v801_v36 }
 0x32f   :  { %v808_v63 = vrot.slane %v805_v61, 7 }
 0x331   :  { %v810_v0 = vsel %vm809_vm8, %v808_v63, %v804_v62 }
 0x332   :  { %812 = vst [vmem:[#allocation2] sm:$0x3] %v810_v0 }
 0x333   :  { %1200 = shalt.err (!%p1197_p4)
}
 0x334   :  { %s1201_s12 = scalar_lea.hbm %s1553_s7, 32 }
 0x335   :  { %p1202_p5 = scmp.ne.s32.totalorder %s1553_s7, %s1201_s12  ;;  %p1205_p6 = scmp.lt.u32.totalorder %s1201_s12, %s1553_s7 }
 0x337   :  { %p1207_p7 = pnand %p1205_p6, %p1202_p5 }
 0x339   :  { %1210 = shalt.err (!%p1207_p7)
}
 0x33a   :  { %822 = dma.vmem_to_hbm [thread:$0]  %s820_s9, 32, %s1553_s7, [#allocation3]  }
 0x33b   :  { %1211 = dma.done.wait [#allocation3], 32  }
 0x33c   :  { %1212 = vsyncadd [#allocation3], 4294967264 }
 0x33d   :  { %826 = vsyncpa [#allocation3], 1 }

</bundles_post_ra>
